<compile_context>
chip_gen: v6e
topology: v6e:2x2x1
jax: 0.10.0
libtpu: 0.0.40
codegen_flags: <defaults>
</compile_context>

<pallas_src>
import functools

import jax
import jax.numpy as jnp
from jax import lax
from jax.experimental import pallas as pl
from jax.experimental.pallas import tpu as pltpu


def _vmem_capacity_bytes():
    """Physical VMEM per core (falls back to the v5e/v6e 128 MiB)."""
    try:
        cap = getattr(pltpu.get_tpu_info(), "vmem_capacity_bytes", None)
        if cap:
            return int(cap)
    except Exception:
        pass
    return 128 << 20


def _write_scores(pooled_f32, w_ref, o_ref):
    # pooled_f32: (TN, TC) f32; w_ref: (TC, K); o_ref: (TN, K)
    w = w_ref[...].astype(jnp.float32)
    o_ref[...] = jnp.dot(pooled_f32, w, preferred_element_type=jnp.float32)


def _head_kernel_single(x_ref, w_ref, o_ref, *, inv_s):
    # Single S tile covering the full true S: no masking, no accumulator.
    pooled = jnp.sum(x_ref[...].astype(jnp.float32), axis=-1) * inv_s
    _write_scores(pooled, w_ref, o_ref)


def _head_kernel_multi(x_ref, w_ref, o_ref, acc_ref, *, inv_s, ts, true_s,
                       need_mask):
    # x_ref: (TN, TC, TS) with TS % 128 == 0; acc_ref: (TN, TC, 128) f32,
    # resident across the (innermost) S grid axis.
    s = pl.program_id(2)

    @pl.when(s == 0)
    def _():
        acc_ref[...] = jnp.zeros_like(acc_ref)

    x = x_ref[...]
    if need_mask:
        # Zero the garbage lanes past the true S on the tail tile (no HBM pad).
        lane = lax.broadcasted_iota(jnp.int32, (1, 1, ts), 2)
        x = jnp.where(s * ts + lane < true_s, x, 0)
    xf = x.astype(jnp.float32)

    # Lane-partial accumulation: 128-aligned lane slices -> pure VALU adds
    # (no per-step cross-lane XLU reduce).
    partial = xf[:, :, 0:128]
    for k in range(1, ts // 128):
        partial = partial + xf[:, :, k * 128:(k + 1) * 128]
    acc_ref[...] += partial

    @pl.when(s == pl.num_programs(2) - 1)
    def _():
        # The only cross-lane reduce, once per (c, n) tile.
        pooled = jnp.sum(acc_ref[...], axis=-1) * inv_s
        _write_scores(pooled, w_ref, o_ref)


def simple_head_forward(x, weight, bias, *, max_tile_s=2048,
                        x_tile_budget_bytes=None):
    """x: (N, C, T, H, W) (f32 or bf16).  weight: (num_classes, C) (PyTorch
    Linear layout).  bias: (num_classes,).  Returns (N, num_classes) f32."""
    N, C, T, H, W = x.shape
    K = weight.shape[0]
    S = T * H * W
    itemsize = jnp.dtype(x.dtype).itemsize

    # Row-major (N, C, T, H, W) -> (N, C, S) is layout-free (no copy); if x
    # arrives with a non-default layout, flatten it upstream instead.
    x_flat = x.reshape(N, C, S)

    vmem_cap = _vmem_capacity_bytes()
    vmem_ceiling = int(0.8 * vmem_cap)          # leave compiler headroom
    if x_tile_budget_bytes is None:
        # ~12 MiB / buffer on 64 MiB-VMEM chips (v7x), ~20 MiB on 128 MiB chips.
        x_tile_budget_bytes = (12 << 20) if vmem_cap <= (64 << 20) else (20 << 20)

    # ---- N tiling: no padding; OOB output rows on the tail tile are dropped.
    TN = N if N <= 8 else 8
    num_n = pl.cdiv(N, TN)

    # ---- Optional channel split: when the batch is a single N tile, add a
    # second "parallel" grid step so both v7x TensorCores have work.
    NC = 2 if (num_n == 1 and C >= 16 and C % 16 == 0) else 1
    TC = C // NC

    # ---- S tiling: lane axis.  One full tile if it fits the budget, else
    # 128-aligned streaming tiles with in-kernel tail masking (no HBM pad).
    ts_cap = (x_tile_budget_bytes // max(1, TN * TC * itemsize)) // 128 * 128
    ts_cap = max(128, min(int(ts_cap), int(max_tile_s)))
    if S <= ts_cap:
        TS, num_s = S, 1
    else:
        TS, num_s = ts_cap, pl.cdiv(S, ts_cap)

    w_t = weight.T.reshape(C, K)                # (C, K): lane-dense matmul out
    w_bytes = jnp.dtype(w_t.dtype).itemsize
    inv_s = float(1.0 / S)

    grid = (NC, num_n, num_s)
    x_spec = pl.BlockSpec((TN, TC, TS), lambda c, n, s: (n, c, s))
    w_spec = pl.BlockSpec((TC, K), lambda c, n, s: (c, 0))
    o_spec = pl.BlockSpec((None, TN, K), lambda c, n, s: (c, n, 0))

    if num_s == 1:
        kernel = functools.partial(_head_kernel_single, inv_s=inv_s)
        scratch_shapes = []
    else:
        kernel = functools.partial(_head_kernel_multi, inv_s=inv_s, ts=TS,
                                   true_s=S, need_mask=(S % TS != 0))
        scratch_shapes = [pltpu.VMEM((TN, TC, 128), jnp.float32)]

    needed = (2 * TN * TC * TS * itemsize       # double-buffered x tile
              + 2 * TC * K * w_bytes            # weight buffers
              + 2 * TN * K * 4                  # output block buffers
              + TN * TC * 128 * 4)              # lane-partial accumulator
    vmem_limit = int(min(max(needed + (4 << 20), 32 << 20), vmem_ceiling))

    partials = pl.pallas_call(
        kernel,
        out_shape=jax.ShapeDtypeStruct((NC, N, K), jnp.float32),
        grid_spec=pltpu.PrefetchScalarGridSpec(
            num_scalar_prefetch=0,
            grid=grid,
            in_specs=[x_spec, w_spec],
            out_specs=o_spec,
            scratch_shapes=scratch_shapes,
        ),
        compiler_params=pltpu.CompilerParams(
            dimension_semantics=("parallel", "parallel", "arbitrary"),
            vmem_limit_bytes=vmem_limit,
        ),
        cost_estimate=pl.CostEstimate(
            flops=int(N * C * S + 2 * N * C * K),
            transcendentals=0,
            bytes_accessed=int(N * C * S * itemsize + C * K * w_bytes
                               + NC * N * K * 4),
        ),
    )(x_flat, w_t)

    # Tiny (N, K) epilogue: combine channel-split partials and add the bias.
    out = partials[0] if NC == 1 else partials.sum(axis=0)
    return out + bias.astype(jnp.float32)[None, :]


def init_params(key, num_classes, in_channels, init_std=0.01):
    """Matches SimpleHead.init_weights: weight ~ N(0, init_std), bias = 0."""
    w_key, _ = jax.random.split(key)
    weight = init_std * jax.random.normal(
        w_key, (num_classes, in_channels), dtype=jnp.float32)
    bias = jnp.zeros((num_classes,), dtype=jnp.float32)
    return weight, bias


def _reference(x, weight, bias):
    N, C = x.shape[0], x.shape[1]
    pooled = x.reshape(N, C, -1).mean(axis=-1).astype(jnp.float32)
    return pooled @ weight.T.astype(jnp.float32) + bias.astype(jnp.float32)


if __name__ == "__main__":
    key = jax.random.PRNGKey(0)
    k1, k2, k3, k4, k5, k6 = jax.random.split(key, 6)

    # --- Test 1: small (N, C, T, H, W), single S tile, no channel split.
    N, C, T, H, W, K = 2, 4, 4, 8, 8, 10
    x = jax.random.normal(k1, (N, C, T, H, W), dtype=jnp.float32)
    weight, bias = init_params(k2, K, C)
    ref = _reference(x, weight, bias)
    out = jax.block_until_ready(simple_head_forward(x, weight, bias))
    assert out.shape == (N, K)
    assert jnp.allclose(out, ref, atol=1e-4, rtol=1e-4)

    # --- Test 2: force multiple S tiles (streamed lane-partial accumulator).
    out2 = jax.block_until_ready(simple_head_forward(x, weight, bias,
                                                     max_tile_s=128))
    assert jnp.allclose(out2, ref, atol=1e-4, rtol=1e-4)

    # --- Test 3: N tail (N=10 -> two N tiles, no padding) and unaligned S
    # (S = 3*7*7 = 147) exercising the in-kernel tail mask.
    N3, C3, T3, H3, W3, K3 = 10, 8, 3, 7, 7, 5
    x3 = jax.random.normal(k3, (N3, C3, T3, H3, W3), dtype=jnp.float32)
    w3, b3 = init_params(k4, K3, C3)
    ref3 = _reference(x3, w3, b3)
    out3 = jax.block_until_ready(simple_head_forward(x3, w3, b3))
    assert out3.shape == (N3, K3)
    assert jnp.allclose(out3, ref3, atol=1e-4, rtol=1e-4)
    out3b = jax.block_until_ready(simple_head_forward(x3, w3, b3,
                                                      max_tile_s=128))
    assert jnp.allclose(out3b, ref3, atol=1e-4, rtol=1e-4)

    # --- Test 4: channel-split parallel path (single N tile, C % 16 == 0),
    # both single-tile and streamed S.
    N4, C4, T4, H4, W4, K4 = 3, 32, 4, 8, 8, 7
    x4 = jax.random.normal(k5, (N4, C4, T4, H4, W4), dtype=jnp.float32)
    w4, b4 = init_params(k6, K4, C4)
    ref4 = _reference(x4, w4, b4)
    out4 = jax.block_until_ready(simple_head_forward(x4, w4, b4))
    assert jnp.allclose(out4, ref4, atol=1e-4, rtol=1e-4)
    out4b = jax.block_until_ready(simple_head_forward(x4, w4, b4,
                                                      max_tile_s=128))
    assert jnp.allclose(out4b, ref4, atol=1e-4, rtol=1e-4)

    print("KERNEL_OK")
</pallas_src>

<mosaic_0001>
module attributes {stable_mosaic.version = 11 : i64} {
  func.func @_head_kernel_single(%arg0: i32, %arg1: i32, %arg2: i32, %arg3: memref<2x4x256xf32, #tpu.memory_space<vmem>>, %arg4: memref<4x10xf32, #tpu.memory_space<vmem>>, %arg5: memref<1x2x10xf32, #tpu.memory_space<vmem>>) attributes {dimension_semantics = [#tpu.dimension_semantics<parallel>, #tpu.dimension_semantics<parallel>, #tpu.dimension_semantics<arbitrary>], iteration_bounds = array<i64: 1, 1, 1>, scalar_prefetch = 0 : i64, scratch_operands = 0 : i64, tpu.core_type = #tpu.core_type<tc>, window_params = [{transform_indices = @transform_0, window_bounds = array<i64: 2, 4, 256>}, {transform_indices = @transform_1, window_bounds = array<i64: 4, 10>}, {transform_indices = @transform_2, window_bounds = array<i64: 1, 2, 10>}]} {
    %c0 = arith.constant 0 : index
    %c0_0 = arith.constant 0 : index
    %c0_1 = arith.constant 0 : index
    %0 = vector.load %arg3[%c0, %c0_0, %c0_1] : memref<2x4x256xf32, #tpu.memory_space<vmem>>, vector<2x4x256xf32>
    %cst = arith.constant dense<0.000000e+00> : vector<2x4xf32>
    %1 = vector.multi_reduction <add>, %0, %cst [2] : vector<2x4x256xf32> to vector<2x4xf32>
    %cst_2 = arith.constant 3.906250e-03 : f32
    %2 = vector.broadcast %cst_2 : f32 to vector<2x4xf32>
    %3 = arith.mulf %1, %2 : vector<2x4xf32>
    %c0_3 = arith.constant 0 : index
    %c0_4 = arith.constant 0 : index
    %4 = vector.load %arg4[%c0_3, %c0_4] : memref<4x10xf32, #tpu.memory_space<vmem>>, vector<4x10xf32>
    %cst_5 = arith.constant dense<0.000000e+00> : vector<2x10xf32>
    %5 = tpu.matmul %3, %4, %cst_5 {dimension_numbers = #tpu.dot_dimension_numbers<[1], [0], [0], [1], [0, 0, 1, 1], [], []>} : vector<2x4xf32>, vector<4x10xf32>, vector<2x10xf32> -> vector<2x10xf32>
    %c0_6 = arith.constant 0 : index
    %c0_7 = arith.constant 0 : index
    %c0_8 = arith.constant 0 : index
    %6 = vector.load %arg5[%c0_6, %c0_7, %c0_8] : memref<1x2x10xf32, #tpu.memory_space<vmem>>, vector<1x2x10xf32>
    %7 = vector.shape_cast %6 : vector<1x2x10xf32> to vector<2x10xf32>
    %8 = vector.shape_cast %5 : vector<2x10xf32> to vector<1x2x10xf32>
    tpu.vector_store %arg5[%c0_6, %c0_7, %c0_8], %8 {strides = array<i32>} : memref<1x2x10xf32, #tpu.memory_space<vmem>>, vector<1x2x10xf32>,
    return
  }
  func.func @transform_0(%arg0: i32, %arg1: i32, %arg2: i32) -> (i32, i32, i32) {
    %c0_i32 = arith.constant 0 : i32
    return %arg1, %arg0, %arg2 : i32, i32, i32
  }
  func.func @transform_1(%arg0: i32, %arg1: i32, %arg2: i32) -> (i32, i32) {
    %c0_i32 = arith.constant 0 : i32
    %c0_i32_0 = arith.constant 0 : i32
    return %arg0, %c0_i32 : i32, i32
  }
  func.func @transform_2(%arg0: i32, %arg1: i32, %arg2: i32) -> (i32, i32, i32) {
    %c0_i32 = arith.constant 0 : i32
    %c0_i32_0 = arith.constant 0 : i32
    return %arg0, %arg1, %c0_i32 : i32, i32, i32
  }
}

</mosaic_0001>

<bundles_post_ra>
// kernel: tpu_custom_call.1
= control target key start
LH: loop header
LB: loop body
LE: loop exit
PB: predicated region body
PF: predicated region fallthrough
CT: control target
= control target key end

     0   :  { %7 = vsyncpa [#allocation3], 0  ;;  %s288_s0 = inlined_call_operand.hbm [shape: f32[2,4,256], index: 0, kind: input, shape index: {}]   ;;  %s289_s1 = inlined_call_operand.hbm [shape: f32[4,10], index: 1, kind: input, shape index: {}]   ;;  %s290_s2 = inlined_call_operand.hbm [shape: f32[1,2,10], index: 2, kind: output, shape index: {}]  }
   0x1   :  { %8 = vsyncpa [#allocation6], 0 }
   0x2   :  { %9 = vsyncpa [#allocation4], 0  ;;  %s252_s9 = smov [#allocation2]  }
   0x3   :  { %s15_s10 = sshll.u32 %s252_s9, 4  ;;  %s16_s10 = int_to_ptr.vmem [resolvable:$true] %s15_s10 }
   0x4   :  { %s194_s11 = scalar_lea.vmem %s16_s10, 256  ;;  %p199_p1 = scmp.lt.s32.totalorder %s16_s10, %s16_s10 }
   0x5   :  { %p195_p0 = scmp.ne.s32.totalorder %s16_s10, %s194_s11  ;;  %p200_p2 = scmp.lt.s32.totalorder %s194_s11, %s194_s11 }
   0x7   :  { %p201_p3 = por %p200_p2, %p199_p1 }
   0x9   :  { %p202_p4 = pnand %p201_p3, %p195_p0 }
   0xb   :  { %205 = shalt.err (!%p202_p4)
}
   0xc   :  { %s253_s12 = smov 128   ;;  %s254_s13 = smov 8  }
   0xd   :  { %21 = dma.hbm_to_vmem [thread:$0]  %s288_s0, 256, %s16_s10, [#allocation3], %s253_s12, %s253_s12, %s254_s13  }
   0xe   :  { %s255_s16 = smov [#allocation5]  }
   0xf   :  { %s28_s17 = sshll.u32 %s255_s16, 4  ;;  %s29_s17 = int_to_ptr.vmem [resolvable:$true] %s28_s17 }
  0x10   :  { %s214_s18 = scalar_lea.vmem %s29_s17, 64  ;;  %p219_p6 = scmp.lt.s32.totalorder %s29_s17, %s29_s17 }
  0x11   :  { %p215_p5 = scmp.ne.s32.totalorder %s29_s17, %s214_s18  ;;  %p220_p7 = scmp.lt.s32.totalorder %s214_s18, %s214_s18 }
  0x13   :  { %p221_p8 = por %p220_p7, %p219_p6 }
  0x15   :  { %p222_p9 = pnand %p221_p8, %p215_p5 }
  0x17   :  { %225 = shalt.err (!%p222_p9)
}
  0x18   :  { %31 = dma.hbm_to_vmem [thread:$0]  %s289_s1, 64, %s29_s17, [#allocation6]  }
  0x19   :  { %246 = dma.done.wait [#allocation3], 256  }
  0x1a   :  { %247 = vsyncadd [#allocation3], 4294967040 }
  0x1b   :  { %248 = dma.done.wait [#allocation6], 64  }
  0x1c   :  { %249 = vsyncadd [#allocation6], 4294967232  ;;  %vm46_vm0 = vcmask 1043456   ;;  %v38_v0 = vld [vmem:[#allocation2] sm:$0xff]  ;;  %v39_v1 = vld [vmem:[#allocation2 + $0x8] sm:$0xff]  ;;  %v256_v11 = vmov 0.0   ;;  %v62_v12 = vlaneseq }
  0x1d   :  { %v42_v2 = vcombine.high %v38_v0, %v38_v0  ;;  %v47_v3 = vsel %vm46_vm0, %v38_v0, 0.0  ;;  %v43_v4 = vcombine.high %v39_v1, %v39_v1  ;;  %v52_v6 = vsel %vm46_vm0, %v39_v1, 0.0  ;;  %v59_v10 = vld [vmem:[#allocation5] sm:$0xf]  ;;  %172 = vmatprep.subr.mxu0 %v256_v11  ;;  %s258_s0 = smov [#allocation7]  }
  0x1e   :  { %vm257_vm1 = vmmov 0   ;;  %173 = vmatpush3.msk.msra.mxu0 %vm46_vm0, %v59_v10  ;;  %v63_v13 = vand.u32 127, %v62_v12  ;;  %v65_v14 = vshrl.u32 %v62_v12, 7  ;;  %vm72_vm2 = vcmask 1041409   ;;  %s158_s1 = sshll.u32 %s258_s0, 4  ;;  %s159_s1 = int_to_ptr.vmem [resolvable:$true] %s158_s1 }
  0x1f   :  { %v48_v5 = vsel %vm46_vm0, %v42_v2, 0.0  ;;  %v53_v7 = vsel %vm46_vm0, %v43_v4, 0.0  ;;  %174 = vmatprep.mubr.msk.f32.mxu0 %vm257_vm1, %v256_v11  ;;  %vm74_vm3 = vcmask 31744   ;;  %vm150_vm4 = vcmask 74752   ;;  %s226_s21 = scalar_lea.vmem %s159_s1, 32  ;;  %p231_p11 = scmp.lt.s32.totalorder %s159_s1, %s159_s1 }
  0x20   :  { %v49_v8 = vadd.f32 %v48_v5, %v47_v3  ;;  %v54_v9 = vadd.f32 %v53_v7, %v52_v6  ;;  %v66_v16 = vsub.s32 %v63_v13, %v65_v14  ;;  %p227_p10 = scmp.ne.s32.totalorder %s159_s1, %s226_s21  ;;  %p232_p12 = scmp.lt.s32.totalorder %s226_s21, %s226_s21 }
  0x22   :  { %50 = vadd.xlane.f32.xlu0 %v49_v8  ;;  %p233_p13 = por %p232_p12, %p231_p11 }
  0x24   :  { %p234_p0 = pnand %p233_p13, %p227_p10 }
  0x26   :  { %55 = vadd.xlane.f32.xlu0 %v54_v9 }
  0xab   :  { %v51_v15 = vpop.xlane.xlu0 %50 }
  0xac   :  { %v57_v17 = vmul.f32 0.00390625, %v51_v15 }
  0xae   :  { %v67_v20 = vrot.slane %v57_v17, %v66_v16 }
  0xaf   :  { %v56_v18 = vpop.xlane.xlu0 %55 }
  0xb0   :  { %v58_v19 = vmul.f32 0.00390625, %v56_v18 }
  0xb2   :  { %v71_v21 = vrot.slane %v58_v19, %v66_v16 }
  0xb4   :  { %v73_v22 = vsel %vm72_vm2, %v71_v21, %v67_v20 }
  0xb5   :  { %175 = vmatmul.mubr.msk.f32.vlgmr.msra.gmra.mxu0 %vm74_vm3, %v73_v22 }
 0x175   :  { %v146_v23 = vpop.f32.mrf.mxu0 }
 0x176   :  { %151 = vst.msk [vmem:[#allocation7] sm:$0x3] %vm150_vm4, %v146_v23 }
 0x177   :  { %v176_v24 = vpop.f32.mrf.mxu0 }
 0x178   :  { %237 = shalt.err (!%p234_p0)
}
 0x179   :  { %161 = dma.vmem_to_hbm [thread:$0]  %s159_s1, 32, %s290_s2, [#allocation4]  }
 0x17a   :  { %250 = dma.done.wait [#allocation4], 32  }
 0x17b   :  { %251 = vsyncadd [#allocation4], 4294967264 }
 0x17c   :  { %165 = vsyncpa [#allocation3], 1 }
 0x17d   :  { %166 = vsyncpa [#allocation6], 1 }
 0x17e   :  { %167 = vsyncpa [#allocation4], 1 }

</bundles_post_ra>
